<compile_context>
chip_gen: v7x
topology: tpu7x:2x2x1
jax: 0.10.0
libtpu: 0.0.40
codegen_flags: <defaults>
</compile_context>

<pallas_src>
import math

import jax
import jax.numpy as jnp
from jax import lax
from jax.experimental import pallas as pl
from jax.experimental.pallas import tpu as pltpu

LANES = 128
CHUNK_ROWS = 256       # in-kernel accumulation chunk: bounds live vregs / spill
MAX_TILE_ROWS = 2048   # 2048x128 f32 = 1 MiB per input per buffer -> 6 MiB VMEM total
HALF_LOG_2PI = 0.5 * math.log(2.0 * math.pi)


def _round_up(x, m):
    return ((x + m - 1) // m) * m


def _cdiv(a, b):
    return -(-a // b)


def _make_kernel(rows, tile_rows, chunk_rows, n_inner, needs_mask):
    """Build the kernel with shape parameters baked in as Python constants."""
    n_chunks = tile_rows // chunk_rows

    def kernel(mu_ref, sd_ref, y_ref, out_ref, acc_ref):
        p = pl.program_id(0)
        k = pl.program_id(1)

        # Zero the lane-dense accumulator at the start of each reduction pass.
        @pl.when(k == 0)
        def _():
            acc_ref[...] = jnp.zeros_like(acc_ref)

        # Global (unclamped) tile index: also covers the overhanging step of an
        # uneven 2-way outer split (its rows are all >= `rows`, so fully masked).
        tile_base = (p * n_inner + k) * tile_rows

        def chunk(c, carry):
            start = pl.multiple_of(c * chunk_rows, chunk_rows)
            rs = pl.ds(start, chunk_rows)
            mu = mu_ref[rs, :].astype(jnp.float32)
            sd = sd_ref[rs, :].astype(jnp.float32)
            y = y_ref[rs, :].astype(jnp.float32)
            diff = y - mu
            if needs_mask:
                row = tile_base + start + lax.broadcasted_iota(
                    jnp.int32, (chunk_rows, LANES), 0)
                valid = row < rows
                # Mask BEFORE log/divide: padded lanes contribute exactly 0.
                sd = jnp.where(valid, sd, jnp.float32(1.0))
                diff = jnp.where(valid, diff, jnp.float32(0.0))
            t = diff * pl.reciprocal(sd, approx=False)
            # Accumulate 2*log|sd| + t^2; the 0.5 and 0.5*log(2*pi) are applied
            # once on the final scalar in the wrapper.  log|sd| (vs log(sd^2))
            # avoids f32 underflow of sd*sd for tiny |sd|.
            core = 2.0 * jnp.log(jnp.abs(sd)) + t * t
            # Fold (chunk_rows,128) -> (chunk_rows//8, 8, 128) and reduce with
            # pure VPU adds into the lane-dense accumulator (no XLU reduce).
            acc_ref[...] += core.reshape(-1, 8, LANES).sum(axis=0)
            return carry

        lax.fori_loop(0, n_chunks, chunk, 0, unroll=True)

        # Emit this outer block's partial sums once, at the end of its pass.
        @pl.when(k == pl.num_programs(1) - 1)
        def _():
            out_ref[0] = acc_ref[...]

    return kernel


def gaussian_nll_loss(mu, sd, y):
    assert mu.shape == sd.shape == y.shape
    n_valid = mu.size

    mu_f = mu.reshape(-1)
    sd_f = sd.reshape(-1)
    y_f = y.reshape(-1)

    tail = n_valid % LANES
    n_prefix = n_valid - tail
    rows = n_prefix // LANES

    total = jnp.float32(0.0)

    # <128-element ragged tail: plain jnp (at most 127 elements, negligible),
    # so the kernel inputs never need a padded HBM copy.
    if tail > 0:
        mu_t = mu_f[n_prefix:].astype(jnp.float32)
        sd_t = sd_f[n_prefix:].astype(jnp.float32)
        y_t = y_f[n_prefix:].astype(jnp.float32)
        d_t = y_t - mu_t
        total = total + jnp.sum(2.0 * jnp.log(jnp.abs(sd_t)) + (d_t / sd_t) ** 2)

    if rows > 0:
        if tail > 0:
            mu_f, sd_f, y_f = mu_f[:n_prefix], sd_f[:n_prefix], y_f[:n_prefix]
        mu2 = mu_f.reshape(rows, LANES)
        sd2 = sd_f.reshape(rows, LANES)
        y2 = y_f.reshape(rows, LANES)

        # Tile sizing: chunk_rows (multiple of 16) divides tile_rows; large
        # tiles amortize the ~0.35 us/grid-step overhead.
        chunk_rows = min(CHUNK_ROWS, _round_up(rows, 16))
        tile_rows = min(MAX_TILE_ROWS, _round_up(rows, chunk_rows))
        total_tiles = _cdiv(rows, tile_rows)

        # Outer "parallel" axis: both v7x TensorCores whenever >= 2 tiles.
        n_outer = 2 if total_tiles >= 2 else 1
        n_inner = _cdiv(total_tiles, n_outer)
        # Mask only when some grid step covers rows >= `rows` (ragged last tile
        # or overhanging step of an uneven 2-way split).
        needs_mask = rows != n_outer * n_inner * tile_rows

        def in_index(p_, k_):
            # Clamp the overhanging step's DMA; its compute is fully masked.
            return (jnp.minimum(p_ * n_inner + k_, total_tiles - 1), 0)

        in_spec = pl.BlockSpec((tile_rows, LANES), in_index)
        out_spec = pl.BlockSpec((1, 8, LANES), lambda p_, k_: (p_, 0, 0))

        cost = pl.CostEstimate(
            flops=6 * n_prefix,
            transcendentals=2 * n_prefix,
            bytes_accessed=3 * n_prefix * mu.dtype.itemsize
            + n_outer * 8 * LANES * 4,
        )

        partials = pl.pallas_call(
            _make_kernel(rows, tile_rows, chunk_rows, n_inner, needs_mask),
            out_shape=jax.ShapeDtypeStruct((n_outer, 8, LANES), jnp.float32),
            grid_spec=pltpu.PrefetchScalarGridSpec(
                num_scalar_prefetch=0,
                grid=(n_outer, n_inner),
                in_specs=[in_spec, in_spec, in_spec],
                out_specs=out_spec,
                scratch_shapes=[pltpu.VMEM((8, LANES), jnp.float32)],
            ),
            compiler_params=pltpu.CompilerParams(
                dimension_semantics=("parallel", "arbitrary"),
            ),
            cost_estimate=cost,
        )(mu2, sd2, y2)

        total = total + jnp.sum(partials)

    # mean(0.5*log(2*pi*sd^2) + 0.5*(y-mu)^2/sd^2)
    #   = 0.5 * mean(2*log|sd| + ((y-mu)/sd)^2) + 0.5*log(2*pi)
    return 0.5 * total / jnp.float32(n_valid) + jnp.float32(HALF_LOG_2PI)


def gaussian_nll_loss_ref(mu, sd, y):
    nll = 0.5 * jnp.log(2.0 * math.pi * sd**2) + 0.5 * (y - mu) ** 2 / sd**2
    return jnp.mean(nll)


if __name__ == "__main__":
    key = jax.random.PRNGKey(0)

    def make_inputs(k, shape):
        k_mu, k_sd, k_y = jax.random.split(k, 3)
        mu = jax.random.normal(k_mu, shape, dtype=jnp.float32)
        sd = jax.nn.softplus(jax.random.normal(k_sd, shape, dtype=jnp.float32)) + 0.1
        y = jax.random.normal(k_y, shape, dtype=jnp.float32)
        return mu, sd, y

    shapes = [
        (2, 4, 16, 16),    # small NCHW shape consistent with the module
        (3, 5, 7, 11),     # n % 128 != 0 -> wrapper tail + in-kernel row mask
        (4, 4, 160, 160),  # rows > tile_rows -> 2 outer blocks + ragged last tile
    ]
    keys = jax.random.split(key, len(shapes))
    for k, shape in zip(keys, shapes):
        mu, sd, y = make_inputs(k, shape)
        loss = gaussian_nll_loss(mu, sd, y)
        jax.block_until_ready(loss)
        ref = gaussian_nll_loss_ref(mu, sd, y)
        assert jnp.allclose(loss, ref, rtol=1e-4, atol=1e-4), (shape, loss, ref)

    print("KERNEL_OK")
</pallas_src>

<mosaic_0001>
module attributes {stable_mosaic.version = 11 : i64} {
  func.func @kernel(%arg0: i32, %arg1: i32, %arg2: memref<16x128xf32, #tpu.memory_space<vmem>>, %arg3: memref<16x128xf32, #tpu.memory_space<vmem>>, %arg4: memref<16x128xf32, #tpu.memory_space<vmem>>, %arg5: memref<1x8x128xf32, #tpu.memory_space<vmem>>, %arg6: memref<8x128xf32, #tpu.memory_space<vmem>>) attributes {dimension_semantics = [#tpu.dimension_semantics<parallel>, #tpu.dimension_semantics<arbitrary>], iteration_bounds = array<i64: 1, 1>, scalar_prefetch = 0 : i64, scratch_operands = 1 : i64, tpu.core_type = #tpu.core_type<tc>, window_params = [{transform_indices = @transform_0, window_bounds = array<i64: 16, 128>}, {transform_indices = @transform_1, window_bounds = array<i64: 16, 128>}, {transform_indices = @transform_2, window_bounds = array<i64: 16, 128>}, {transform_indices = @transform_3, window_bounds = array<i64: 1, 8, 128>}]} {
    %c0_i32 = arith.constant 0 : i32
    %0 = arith.cmpi eq, %arg1, %c0_i32 : i32
    %1 = arith.extui %0 : i1 to i32
    %c0_i32_0 = arith.constant 0 : i32
    %2 = arith.cmpi ne, %1, %c0_i32_0 : i32
    scf.if %2 {
      %cst_11 = arith.constant 0.000000e+00 : f32
      %28 = vector.broadcast %cst_11 : f32 to vector<8x128xf32>
      %c0_12 = arith.constant 0 : index
      %c0_13 = arith.constant 0 : index
      %29 = vector.load %arg6[%c0_12, %c0_13] : memref<8x128xf32, #tpu.memory_space<vmem>>, vector<8x128xf32>
      tpu.vector_store %arg6[%c0_12, %c0_13], %28 {strides = array<i32>} : memref<8x128xf32, #tpu.memory_space<vmem>>, vector<8x128xf32>,
    } else {
    }
    %c0_i32_1 = arith.constant 0 : i32
    %c16_i32 = arith.constant 16 : i32
    %3 = arith.muli %c0_i32_1, %c16_i32 : i32
    %4 = tpu.assume_multiple %3, 16 : i32
    %5 = arith.index_cast %4 : i32 to index
    %c0 = arith.constant 0 : index
    %6 = vector.load %arg2[%5, %c0] : memref<16x128xf32, #tpu.memory_space<vmem>>, vector<16x128xf32>
    %7 = arith.index_cast %4 : i32 to index
    %c0_2 = arith.constant 0 : index
    %8 = vector.load %arg3[%7, %c0_2] : memref<16x128xf32, #tpu.memory_space<vmem>>, vector<16x128xf32>
    %9 = arith.index_cast %4 : i32 to index
    %c0_3 = arith.constant 0 : index
    %10 = vector.load %arg4[%9, %c0_3] : memref<16x128xf32, #tpu.memory_space<vmem>>, vector<16x128xf32>
    %11 = arith.subf %10, %6 : vector<16x128xf32>
    %12 = tpu.reciprocal %8 : vector<16x128xf32> -> vector<16x128xf32>
    %13 = arith.mulf %11, %12 : vector<16x128xf32>
    %14 = math.absf %8 : vector<16x128xf32>
    %15 = math.log %14 : vector<16x128xf32>
    %cst = arith.constant 2.000000e+00 : f32
    %16 = vector.broadcast %cst : f32 to vector<16x128xf32>
    %17 = arith.mulf %16, %15 : vector<16x128xf32>
    %18 = arith.mulf %13, %13 : vector<16x128xf32>
    %19 = arith.addf %17, %18 : vector<16x128xf32>
    %c0_4 = arith.constant 0 : index
    %c0_5 = arith.constant 0 : index
    %20 = vector.load %arg6[%c0_4, %c0_5] : memref<8x128xf32, #tpu.memory_space<vmem>>, vector<8x128xf32>
    %21 = vector.shape_cast %19 : vector<16x128xf32> to vector<2x8x128xf32>
    %cst_6 = arith.constant dense<0.000000e+00> : vector<8x128xf32>
    %22 = vector.multi_reduction <add>, %21, %cst_6 [0] : vector<2x8x128xf32> to vector<8x128xf32>
    %23 = arith.addf %20, %22 : vector<8x128xf32>
    %c0_7 = arith.constant 0 : index
    %c0_8 = arith.constant 0 : index
    %24 = vector.load %arg6[%c0_7, %c0_8] : memref<8x128xf32, #tpu.memory_space<vmem>>, vector<8x128xf32>
    tpu.vector_store %arg6[%c0_7, %c0_8], %23 {strides = array<i32>} : memref<8x128xf32, #tpu.memory_space<vmem>>, vector<8x128xf32>,
    %c1_i32 = arith.constant 1 : i32
    %c0_i32_9 = arith.constant 0 : i32
    %25 = arith.cmpi eq, %arg1, %c0_i32_9 : i32
    %26 = arith.extui %25 : i1 to i32
    %c0_i32_10 = arith.constant 0 : i32
    %27 = arith.cmpi ne, %26, %c0_i32_10 : i32
    scf.if %27 {
      %c0_11 = arith.constant 0 : index
      %c0_12 = arith.constant 0 : index
      %28 = vector.load %arg6[%c0_11, %c0_12] : memref<8x128xf32, #tpu.memory_space<vmem>>, vector<8x128xf32>
      %c0_13 = arith.constant 0 : index
      %c0_14 = arith.constant 0 : index
      %c0_15 = arith.constant 0 : index
      %29 = vector.load %arg5[%c0_13, %c0_14, %c0_15] : memref<1x8x128xf32, #tpu.memory_space<vmem>>, vector<1x8x128xf32>
      %30 = vector.shape_cast %29 : vector<1x8x128xf32> to vector<8x128xf32>
      %31 = vector.shape_cast %28 : vector<8x128xf32> to vector<1x8x128xf32>
      tpu.vector_store %arg5[%c0_13, %c0_14, %c0_15], %31 {strides = array<i32>} : memref<1x8x128xf32, #tpu.memory_space<vmem>>, vector<1x8x128xf32>,
    } else {
    }
    return
  }
  func.func @transform_0(%arg0: i32, %arg1: i32) -> (i32, i32) {
    %c1_i32 = arith.constant 1 : i32
    %0 = arith.muli %arg0, %c1_i32 : i32
    %1 = arith.addi %0, %arg1 : i32
    %c0_i32 = arith.constant 0 : i32
    %2 = arith.minsi %1, %c0_i32 : i32
    %c0_i32_0 = arith.constant 0 : i32
    %c0_i32_1 = arith.constant 0 : i32
    return %2, %c0_i32_0 : i32, i32
  }
  func.func @transform_1(%arg0: i32, %arg1: i32) -> (i32, i32) {
    %c1_i32 = arith.constant 1 : i32
    %0 = arith.muli %arg0, %c1_i32 : i32
    %1 = arith.addi %0, %arg1 : i32
    %c0_i32 = arith.constant 0 : i32
    %2 = arith.minsi %1, %c0_i32 : i32
    %c0_i32_0 = arith.constant 0 : i32
    %c0_i32_1 = arith.constant 0 : i32
    return %2, %c0_i32_0 : i32, i32
  }
  func.func @transform_2(%arg0: i32, %arg1: i32) -> (i32, i32) {
    %c1_i32 = arith.constant 1 : i32
    %0 = arith.muli %arg0, %c1_i32 : i32
    %1 = arith.addi %0, %arg1 : i32
    %c0_i32 = arith.constant 0 : i32
    %2 = arith.minsi %1, %c0_i32 : i32
    %c0_i32_0 = arith.constant 0 : i32
    %c0_i32_1 = arith.constant 0 : i32
    return %2, %c0_i32_0 : i32, i32
  }
  func.func @transform_3(%arg0: i32, %arg1: i32) -> (i32, i32, i32) {
    %c0_i32 = arith.constant 0 : i32
    %c0_i32_0 = arith.constant 0 : i32
    %c0_i32_1 = arith.constant 0 : i32
    return %arg0, %c0_i32, %c0_i32_0 : i32, i32, i32
  }
}

</mosaic_0001>

<bundles_post_ra>
// kernel: tpu_custom_call.1
= control target key start
LH: loop header
LB: loop body
LE: loop exit
PB: predicated region body
PF: predicated region fallthrough
CT: control target
= control target key end

     0   :  { %8 = vsyncpa [#allocation4], 0  ;;  %s344_s0 = inlined_call_operand.hbm [shape: f32[16,128], index: 0, kind: input, shape index: {}]   ;;  %s345_s1 = inlined_call_operand.hbm [shape: f32[16,128], index: 1, kind: input, shape index: {}]   ;;  %s346_s2 = inlined_call_operand.hbm [shape: f32[16,128], index: 2, kind: input, shape index: {}]   ;;  %s347_s3 = inlined_call_operand.hbm [shape: f32[1,8,128], index: 3, kind: output, shape index: {}]  }
   0x1   :  { %9 = vsyncpa [#allocation7], 0 }
   0x2   :  { %10 = vsyncpa [#allocation5], 0  ;;  %s254_s12 = smov [#allocation6]   ;;  %s255_s14 = smov [#allocation3]  }
   0x3   :  { %s40_s13 = sshll.u32 %s254_s12, 4  ;;  %s22_s15 = sshll.u32 %s255_s14, 4  ;;  %s41_s13 = int_to_ptr.vmem [resolvable:$true] %s40_s13  ;;  %s280_s15 = int_to_ptr.vmem [resolvable:$true] %s22_s15 }
   0x4   :  { %s160_s18 = scalar_lea.hbm %s345_s1, 256 }
   0x5   :  { %p161_p0 = scmp.ne.s32.totalorder %s345_s1, %s160_s18  ;;  %p164_p1 = scmp.lt.u32.totalorder %s160_s18, %s345_s1 }
   0x7   :  { %p166_p2 = pnand %p164_p1, %p161_p0 }
   0x9   :  { %169 = shalt.err (!%p166_p2)
}
   0xa   :  { %s170_s23 = scalar_lea.vmem %s41_s13, 256  ;;  %p175_p4 = scmp.lt.s32.totalorder %s41_s13, %s41_s13 }
   0xb   :  { %p171_p3 = scmp.ne.s32.totalorder %s41_s13, %s170_s23  ;;  %p176_p5 = scmp.lt.s32.totalorder %s170_s23, %s170_s23 }
   0xd   :  { %p177_p6 = por %p176_p5, %p175_p4 }
   0xf   :  { %p178_p7 = pnand %p177_p6, %p171_p3 }
  0x11   :  { %181 = shalt.err (!%p178_p7)
}
  0x12   :  { %s256_s24 = smov 128   ;;  %s257_s25 = smov 8  }
  0x13   :  { %46 = dma.hbm_to_vmem [thread:$0]  %s345_s1, 256, %s41_s13, [#allocation7], %s256_s24, %s256_s24, %s257_s25  }
  0x14   :  { %s182_s30 = scalar_lea.hbm %s344_s0, 256 }
  0x15   :  { %p183_p8 = scmp.ne.s32.totalorder %s344_s0, %s182_s30  ;;  %p186_p9 = scmp.lt.u32.totalorder %s182_s30, %s344_s0 }
  0x17   :  { %p188_p10 = pnand %p186_p9, %p183_p8 }
  0x19   :  { %191 = shalt.err (!%p188_p10)
}
  0x1a   :  { %s192_s8 = scalar_lea.vmem %s280_s15, 256  ;;  %p197_p12 = scmp.lt.s32.totalorder %s280_s15, %s280_s15 }
  0x1b   :  { %p193_p11 = scmp.ne.s32.totalorder %s280_s15, %s192_s8  ;;  %p198_p13 = scmp.lt.s32.totalorder %s192_s8, %s192_s8 }
  0x1d   :  { %p199_p0 = por %p198_p13, %p197_p12 }
  0x1f   :  { %p200_p1 = pnand %p199_p0, %p193_p11 }
  0x21   :  { %203 = shalt.err (!%p200_p1)
}
  0x22   :  { %28 = dma.hbm_to_vmem [thread:$0]  %s344_s0, 256, %s280_s15, [#allocation4], %s256_s24, %s256_s24, %s257_s25  }
  0x23   :  { %s258_s10 = smov [#allocation8]   ;;  %s204_s14 = scalar_lea.hbm %s346_s2, 256 }
  0x24   :  { %s58_s11 = sshll.u32 %s258_s10, 4  ;;  %p205_p2 = scmp.ne.s32.totalorder %s346_s2, %s204_s14  ;;  %s59_s11 = int_to_ptr.vmem [resolvable:$true] %s58_s11 }
  0x25   :  { %p208_p3 = scmp.lt.u32.totalorder %s204_s14, %s346_s2 }
  0x27   :  { %p210_p4 = pnand %p208_p3, %p205_p2 }
  0x29   :  { %213 = shalt.err (!%p210_p4)
}
  0x2a   :  { %s214_s20 = scalar_lea.vmem %s59_s11, 256  ;;  %p219_p6 = scmp.lt.s32.totalorder %s59_s11, %s59_s11 }
  0x2b   :  { %p215_p5 = scmp.ne.s32.totalorder %s59_s11, %s214_s20  ;;  %p220_p7 = scmp.lt.s32.totalorder %s214_s20, %s214_s20 }
  0x2d   :  { %p221_p8 = por %p220_p7, %p219_p6 }
  0x2f   :  { %p222_p9 = pnand %p221_p8, %p215_p5 }
  0x31   :  { %225 = shalt.err (!%p222_p9)
}
  0x32   :  { %64 = dma.hbm_to_vmem [thread:$0]  %s346_s2, 256, %s59_s11, [#allocation7], %s256_s24, %s256_s24, %s257_s25  }
  0x33   :  { %248 = dma.done.wait [#allocation4], 256  }
  0x34   :  { %249 = vsyncadd [#allocation4], 4294967040 }
  0x35   :  { %250 = dma.done.wait [#allocation7], 512  }
  0x36   :  { %251 = vsyncadd [#allocation7], 4294966784  ;;  %v93_v0 = vld [vmem:[#allocation6] sm:$0xff]  ;;  %v94_v1 = vld [vmem:[#allocation6 + $0x8] sm:$0xff]  ;;  %s259_s2 = smov [#allocation9]  }
  0x37   :  { %152 = vrcp.f32 %v93_v0  ;;  %v103_v2 = vand.u32 2147483647, %v93_v0  ;;  %v104_v3 = vand.u32 2147483647, %v94_v1  ;;  %v91_v4 = vld [vmem:[#allocation3] sm:$0xff]  ;;  %v92_v6 = vld [vmem:[#allocation3 + $0x8] sm:$0xff] }
  0x38   :  { %154 = vrcp.f32 %v94_v1  ;;  %v95_v5 = vld [vmem:[#allocation8] sm:$0xff]  ;;  %v96_v7 = vld [vmem:[#allocation8 + $0x8] sm:$0xff]  ;;  %s130_s21 = sshll.u32 %s259_s2, 4  ;;  %s131_s21 = int_to_ptr.vmem [resolvable:$true] %s130_s21 }
  0x39   :  { %156 = vlog2.f32 %v103_v2  ;;  %v97_v8 = vsub.f32 %v95_v5, %v91_v4  ;;  %v98_v9 = vsub.f32 %v96_v7, %v92_v6  ;;  %s226_s22 = scalar_lea.vmem %s131_s21, 128  ;;  %p231_p11 = scmp.lt.s32.totalorder %s131_s21, %s131_s21 }
  0x3a   :  { %158 = vlog2.f32 %v104_v3  ;;  %p227_p10 = scmp.ne.s32.totalorder %s131_s21, %s226_s22  ;;  %p232_p12 = scmp.lt.s32.totalorder %s226_s22, %s226_s22 }
  0x3c   :  { %p233_p13 = por %p232_p12, %p231_p11 }
  0x3e   :  { %p234_p0 = pnand %p233_p13, %p227_p10 }
  0x41   :  { %v153_v10 = vpop.eup %152 }
  0x42   :  { %v155_v11 = vpop.eup %154  ;;  %v101_v12 = vmul.f32 %v153_v10, %v97_v8 }
  0x43   :  { %v157_v13 = vpop.eup %156  ;;  %v102_v14 = vmul.f32 %v155_v11, %v98_v9 }
  0x44   :  { %v159_v15 = vpop.eup %158  ;;  %v106_v16 = vmul.f32 0.6931472, %v157_v13  ;;  %v111_v17 = vmul.f32 %v101_v12, %v101_v12 }
  0x45   :  { %v108_v18 = vmul.f32 0.6931472, %v159_v15  ;;  %v112_v19 = vmul.f32 %v102_v14, %v102_v14 }
  0x46   :  { %v109_v20 = vmul.f32 2.0, %v106_v16 }
  0x47   :  { %v110_v21 = vmul.f32 2.0, %v108_v18 }
  0x48   :  { %v113_v22 = vadd.f32 %v111_v17, %v109_v20 }
  0x49   :  { %v114_v23 = vadd.f32 %v112_v19, %v110_v21 }
  0x4b   :  { %v116_v24 = vadd.f32 %v114_v23, %v113_v22 }
  0x4d   :  { %123 = vst [vmem:[#allocation9] sm:$0xff] %v116_v24 }
  0x4e   :  { %237 = shalt.err (!%p234_p0)
}
  0x4f   :  { %s238_s25 = scalar_lea.hbm %s347_s3, 128 }
  0x50   :  { %p239_p1 = scmp.ne.s32.totalorder %s347_s3, %s238_s25  ;;  %p242_p2 = scmp.lt.u32.totalorder %s238_s25, %s347_s3 }
  0x52   :  { %p244_p3 = pnand %p242_p2, %p239_p1 }
  0x54   :  { %247 = shalt.err (!%p244_p3)
}
  0x55   :  { %133 = dma.vmem_to_hbm [thread:$0]  %s131_s21, 128, %s347_s3, [#allocation5]  }
  0x56   :  { %252 = dma.done.wait [#allocation5], 128  }
  0x57   :  { %253 = vsyncadd [#allocation5], 4294967168 }
  0x58   :  { %137 = vsyncpa [#allocation4], 1 }
  0x59   :  { %138 = vsyncpa [#allocation7], 1 }
  0x5a   :  { %139 = vsyncpa [#allocation5], 1 }

</bundles_post_ra>
